<compile_context>
chip_gen: v7x
topology: tpu7x:2x2x1
jax: 0.10.0
libtpu: 0.0.40
codegen_flags: <defaults>
</compile_context>

<pallas_src>
import functools
import math

import jax
import jax.numpy as jnp
from jax.experimental import pallas as pl
from jax.experimental.pallas import tpu as pltpu


def _round_up(x: int, m: int) -> int:
    return (x + m - 1) // m * m


def _vmem_capacity_bytes() -> int:
    """Physical per-core VMEM; conservative fallback if the query fails."""
    try:
        return int(pltpu.get_tpu_info().vmem_capacity_bytes)
    except Exception:
        return 64 << 20  # v7x per-TensorCore VMEM (smallest of v5e/v6e/v7x)


def _embed_kernel(ids_ref, table_hbm, out_ref, table_vmem, *, scale, tb):
    """One grid step: gather `tb` rows (in groups of 8) from the resident table.

    ids_ref    : SMEM (num_tokens_padded,) int32   (scalar prefetch)
    table_hbm  : HBM  (vocab_size, d_model_padded) (memory_space=pl.ANY)
    out_ref    : VMEM (tb, d_model_padded) output block
    table_vmem : VMEM (vocab_size, d_model_padded) scratch, persists across steps
    """
    step = pl.program_id(0)

    # One-shot HBM -> VMEM copy of the (padded) embedding table.  The scratch
    # persists across grid steps and the grid axis is "arbitrary" (sequential
    # on a single TensorCore), so steps > 0 reuse the resident copy.
    @pl.when(step == 0)
    def _():
        pltpu.sync_copy(table_hbm, table_vmem)

    base = step * tb

    # Statically unrolled loop over groups of 8 tokens: 8 dynamic row loads,
    # one sublane-concat (XLU), one full-sublane (8, d_model_p) store.
    for g in range(tb // 8):
        rows = [
            table_vmem[pl.ds(ids_ref[base + g * 8 + j], 1), :]
            for j in range(8)
        ]
        block = jnp.concatenate(rows, axis=0).astype(jnp.float32) * scale
        out_ref[pl.ds(g * 8, 8), :] = block.astype(out_ref.dtype)


def input_embeddings(token_ids, embedding_table, d_model, *,
                     token_block=256, out_dtype=None):
    """Equivalent of InputEmbeddings.forward: embedding(x) * sqrt(d_model).

    Args:
      token_ids: int array of shape (batch, seq).
      embedding_table: (vocab_size, d_model) float32 or bfloat16 table.
      d_model: model dimension (static).
      token_block: tokens processed per grid step (rounded to a multiple of 8).
      out_dtype: output dtype (defaults to the table dtype, like nn.Embedding).

    Returns:
      (batch, seq, d_model) array of dtype `out_dtype`.
    """
    batch, seq = token_ids.shape
    vocab_size, d_model_t = embedding_table.shape
    assert d_model_t == d_model

    if out_dtype is None:
        out_dtype = embedding_table.dtype

    num_tokens = batch * seq
    d_model_p = _round_up(d_model, 128)  # lane-dense output (pad sliced off)

    # Clamp ids so a bad id can never read garbage VMEM.
    # NOTE: this diverges from nn.Embedding, which would raise on OOB ids.
    flat_ids = jnp.clip(
        token_ids.reshape(num_tokens).astype(jnp.int32), 0, vocab_size - 1
    )

    # Token block: multiple of 8 sublanes, no larger than needed.
    tb = min(token_block, _round_up(num_tokens, 8))
    tb = _round_up(max(tb, 8), 8)
    num_tokens_p = _round_up(num_tokens, tb)
    if num_tokens_p != num_tokens:
        flat_ids = jnp.pad(flat_ids, (0, num_tokens_p - num_tokens))

    # Whole-array scalar prefetch pads SMEM to next_pow2(4*N) bytes.
    # TODO(synk): chunk / block the ids for very large batch*seq.
    assert num_tokens_p <= (1 << 16), (
        "token count too large for whole-array scalar-prefetched ids"
    )

    table = embedding_table  # keep source dtype (f32 or bf16); no host upcast
    if d_model_p != d_model:
        table = jnp.pad(table, ((0, 0), (0, d_model_p - d_model)))

    scale = math.sqrt(d_model)

    # Generation-aware VMEM budget: one (single-buffered) resident table copy
    # + double-buffered output block + slack.  Never exceed physical VMEM.
    vmem_cap = _vmem_capacity_bytes()
    table_bytes = vocab_size * d_model_p * table.dtype.itemsize
    out_block_bytes = tb * d_model_p * jnp.dtype(out_dtype).itemsize
    vmem_needed = table_bytes + 2 * out_block_bytes + (1 << 20)
    assert vmem_needed <= int(0.9 * vmem_cap), (
        f"embedding table too large for the VMEM-resident path "
        f"({vmem_needed} B needed, {vmem_cap} B physical VMEM); "
        "TODO(synk): manual-DMA large-vocab path not implemented"
    )
    vmem_limit = int(min(vmem_cap, max(vmem_needed, 16 << 20)))

    kernel = functools.partial(_embed_kernel, scale=scale, tb=tb)

    out_padded = pl.pallas_call(
        kernel,
        out_shape=jax.ShapeDtypeStruct((num_tokens_p, d_model_p), out_dtype),
        grid_spec=pltpu.PrefetchScalarGridSpec(
            num_scalar_prefetch=1,
            grid=(num_tokens_p // tb,),
            in_specs=[
                # Table stays in HBM; copied once into the VMEM scratch below.
                pl.BlockSpec(memory_space=pl.ANY),
            ],
            out_specs=pl.BlockSpec((tb, d_model_p), lambda i, ids: (i, 0)),
            scratch_shapes=[
                pltpu.VMEM((vocab_size, d_model_p), table.dtype),
            ],
        ),
        compiler_params=pltpu.CompilerParams(
            # "arbitrary": sequential on one core -> step-0 table copy is seen
            # by all steps and the table is read from HBM exactly once.
            dimension_semantics=("arbitrary",),
            vmem_limit_bytes=vmem_limit,
        ),
    )(flat_ids, table)

    return out_padded[:num_tokens, :d_model].reshape(batch, seq, d_model)


if __name__ == "__main__":
    # Small, deterministic setup consistent with the module's __init__.
    d_model = 32
    vocab_size = 64
    batch, seq = 2, 8

    key = jax.random.PRNGKey(0)
    k_emb, k_ids = jax.random.split(key)

    # nn.Embedding default init ~ N(0, 1); deterministic synthetic weights.
    embedding_table = jax.random.normal(
        k_emb, (vocab_size, d_model), dtype=jnp.float32
    )
    token_ids = jax.random.randint(
        k_ids, (batch, seq), minval=0, maxval=vocab_size, dtype=jnp.int32
    )

    out = input_embeddings(token_ids, embedding_table, d_model)
    out = jax.block_until_ready(out)

    # Pure-JAX reference check of the same semantics.
    ref = embedding_table[token_ids] * math.sqrt(d_model)
    assert out.shape == (batch, seq, d_model)
    assert jnp.allclose(out, ref, atol=1e-6), "mismatch vs reference"

    print("KERNEL_OK")
</pallas_src>

<mosaic_0001>
module attributes {stable_mosaic.version = 11 : i64} {
  func.func @_embed_kernel(%arg0: i32, %arg1: memref<16xi32, #tpu.memory_space<smem>>, %arg2: memref<64x128xf32, #tpu.memory_space<any>>, %arg3: memref<16x128xf32, #tpu.memory_space<vmem>>, %arg4: memref<64x128xf32, #tpu.memory_space<vmem>>) attributes {dimension_semantics = [#tpu.dimension_semantics<arbitrary>], iteration_bounds = array<i64: 1>, scalar_prefetch = 1 : i64, scratch_operands = 1 : i64, tpu.core_type = #tpu.core_type<tc>, window_params = [{}, {transform_indices = @transform_1, window_bounds = array<i64: 16, 128>}]} {
    %c0_i32 = arith.constant 0 : i32
    %0 = arith.cmpi eq, %arg0, %c0_i32 : i32
    %1 = arith.extui %0 : i1 to i32
    %c0_i32_0 = arith.constant 0 : i32
    %2 = arith.cmpi ne, %1, %c0_i32_0 : i32
    scf.if %2 {
      "tpu.region"() ({
        %108 = tpu.sem_alloc : memref<!tpu.dma_semaphore, #tpu.memory_space<semaphore_mem>>
        tpu.enqueue_dma source(%arg2 : memref<64x128xf32, #tpu.memory_space<any>>) target(%arg4 : memref<64x128xf32, #tpu.memory_space<vmem>>) target_semaphore(%108 : memref<!tpu.dma_semaphore, #tpu.memory_space<semaphore_mem>>)
        tpu.wait_dma2 semaphore(%108 : memref<!tpu.dma_semaphore, #tpu.memory_space<semaphore_mem>>) src(%arg2 : memref<64x128xf32, #tpu.memory_space<any>>) dst(%arg4 : memref<64x128xf32, #tpu.memory_space<vmem>>)
        tpu.yield
      }) : () -> ()
    } else {
    }
    %c16_i32 = arith.constant 16 : i32
    %3 = arith.muli %arg0, %c16_i32 : i32
    %c0_i32_1 = arith.constant 0 : i32
    %4 = arith.addi %3, %c0_i32_1 : i32
    %c0_i32_2 = arith.constant 0 : i32
    %5 = arith.addi %4, %c0_i32_2 : i32
    %6 = arith.index_cast %5 : i32 to index
    %7 = memref.load %arg1[%6] : memref<16xi32, #tpu.memory_space<smem>>
    %8 = arith.index_cast %7 : i32 to index
    %c0 = arith.constant 0 : index
    %9 = vector.load %arg4[%8, %c0] : memref<64x128xf32, #tpu.memory_space<vmem>>, vector<1x128xf32>
    %c0_i32_3 = arith.constant 0 : i32
    %10 = arith.addi %3, %c0_i32_3 : i32
    %c1_i32 = arith.constant 1 : i32
    %11 = arith.addi %10, %c1_i32 : i32
    %12 = arith.index_cast %11 : i32 to index
    %13 = memref.load %arg1[%12] : memref<16xi32, #tpu.memory_space<smem>>
    %14 = arith.index_cast %13 : i32 to index
    %c0_4 = arith.constant 0 : index
    %15 = vector.load %arg4[%14, %c0_4] : memref<64x128xf32, #tpu.memory_space<vmem>>, vector<1x128xf32>
    %c0_i32_5 = arith.constant 0 : i32
    %16 = arith.addi %3, %c0_i32_5 : i32
    %c2_i32 = arith.constant 2 : i32
    %17 = arith.addi %16, %c2_i32 : i32
    %18 = arith.index_cast %17 : i32 to index
    %19 = memref.load %arg1[%18] : memref<16xi32, #tpu.memory_space<smem>>
    %20 = arith.index_cast %19 : i32 to index
    %c0_6 = arith.constant 0 : index
    %21 = vector.load %arg4[%20, %c0_6] : memref<64x128xf32, #tpu.memory_space<vmem>>, vector<1x128xf32>
    %c0_i32_7 = arith.constant 0 : i32
    %22 = arith.addi %3, %c0_i32_7 : i32
    %c3_i32 = arith.constant 3 : i32
    %23 = arith.addi %22, %c3_i32 : i32
    %24 = arith.index_cast %23 : i32 to index
    %25 = memref.load %arg1[%24] : memref<16xi32, #tpu.memory_space<smem>>
    %26 = arith.index_cast %25 : i32 to index
    %c0_8 = arith.constant 0 : index
    %27 = vector.load %arg4[%26, %c0_8] : memref<64x128xf32, #tpu.memory_space<vmem>>, vector<1x128xf32>
    %c0_i32_9 = arith.constant 0 : i32
    %28 = arith.addi %3, %c0_i32_9 : i32
    %c4_i32 = arith.constant 4 : i32
    %29 = arith.addi %28, %c4_i32 : i32
    %30 = arith.index_cast %29 : i32 to index
    %31 = memref.load %arg1[%30] : memref<16xi32, #tpu.memory_space<smem>>
    %32 = arith.index_cast %31 : i32 to index
    %c0_10 = arith.constant 0 : index
    %33 = vector.load %arg4[%32, %c0_10] : memref<64x128xf32, #tpu.memory_space<vmem>>, vector<1x128xf32>
    %c0_i32_11 = arith.constant 0 : i32
    %34 = arith.addi %3, %c0_i32_11 : i32
    %c5_i32 = arith.constant 5 : i32
    %35 = arith.addi %34, %c5_i32 : i32
    %36 = arith.index_cast %35 : i32 to index
    %37 = memref.load %arg1[%36] : memref<16xi32, #tpu.memory_space<smem>>
    %38 = arith.index_cast %37 : i32 to index
    %c0_12 = arith.constant 0 : index
    %39 = vector.load %arg4[%38, %c0_12] : memref<64x128xf32, #tpu.memory_space<vmem>>, vector<1x128xf32>
    %c0_i32_13 = arith.constant 0 : i32
    %40 = arith.addi %3, %c0_i32_13 : i32
    %c6_i32 = arith.constant 6 : i32
    %41 = arith.addi %40, %c6_i32 : i32
    %42 = arith.index_cast %41 : i32 to index
    %43 = memref.load %arg1[%42] : memref<16xi32, #tpu.memory_space<smem>>
    %44 = arith.index_cast %43 : i32 to index
    %c0_14 = arith.constant 0 : index
    %45 = vector.load %arg4[%44, %c0_14] : memref<64x128xf32, #tpu.memory_space<vmem>>, vector<1x128xf32>
    %c0_i32_15 = arith.constant 0 : i32
    %46 = arith.addi %3, %c0_i32_15 : i32
    %c7_i32 = arith.constant 7 : i32
    %47 = arith.addi %46, %c7_i32 : i32
    %48 = arith.index_cast %47 : i32 to index
    %49 = memref.load %arg1[%48] : memref<16xi32, #tpu.memory_space<smem>>
    %50 = arith.index_cast %49 : i32 to index
    %c0_16 = arith.constant 0 : index
    %51 = vector.load %arg4[%50, %c0_16] : memref<64x128xf32, #tpu.memory_space<vmem>>, vector<1x128xf32>
    %52 = tpu.concatenate %9, %15, %21, %27, %33, %39, %45, %51 in 0 : vector<1x128xf32>, vector<1x128xf32>, vector<1x128xf32>, vector<1x128xf32>, vector<1x128xf32>, vector<1x128xf32>, vector<1x128xf32>, vector<1x128xf32> -> vector<8x128xf32>
    %cst = arith.constant 5.65685415 : f32
    %53 = vector.broadcast %cst : f32 to vector<8x128xf32>
    %54 = arith.mulf %52, %53 : vector<8x128xf32>
    %c0_17 = arith.constant 0 : index
    %c0_18 = arith.constant 0 : index
    %55 = vector.load %arg3[%c0_17, %c0_18] : memref<16x128xf32, #tpu.memory_space<vmem>>, vector<8x128xf32>
    tpu.vector_store %arg3[%c0_17, %c0_18], %54 {strides = array<i32>} : memref<16x128xf32, #tpu.memory_space<vmem>>, vector<8x128xf32>,
    %c8_i32 = arith.constant 8 : i32
    %56 = arith.addi %3, %c8_i32 : i32
    %c0_i32_19 = arith.constant 0 : i32
    %57 = arith.addi %56, %c0_i32_19 : i32
    %58 = arith.index_cast %57 : i32 to index
    %59 = memref.load %arg1[%58] : memref<16xi32, #tpu.memory_space<smem>>
    %60 = arith.index_cast %59 : i32 to index
    %c0_20 = arith.constant 0 : index
    %61 = vector.load %arg4[%60, %c0_20] : memref<64x128xf32, #tpu.memory_space<vmem>>, vector<1x128xf32>
    %c8_i32_21 = arith.constant 8 : i32
    %62 = arith.addi %3, %c8_i32_21 : i32
    %c1_i32_22 = arith.constant 1 : i32
    %63 = arith.addi %62, %c1_i32_22 : i32
    %64 = arith.index_cast %63 : i32 to index
    %65 = memref.load %arg1[%64] : memref<16xi32, #tpu.memory_space<smem>>
    %66 = arith.index_cast %65 : i32 to index
    %c0_23 = arith.constant 0 : index
    %67 = vector.load %arg4[%66, %c0_23] : memref<64x128xf32, #tpu.memory_space<vmem>>, vector<1x128xf32>
    %c8_i32_24 = arith.constant 8 : i32
    %68 = arith.addi %3, %c8_i32_24 : i32
    %c2_i32_25 = arith.constant 2 : i32
    %69 = arith.addi %68, %c2_i32_25 : i32
    %70 = arith.index_cast %69 : i32 to index
    %71 = memref.load %arg1[%70] : memref<16xi32, #tpu.memory_space<smem>>
    %72 = arith.index_cast %71 : i32 to index
    %c0_26 = arith.constant 0 : index
    %73 = vector.load %arg4[%72, %c0_26] : memref<64x128xf32, #tpu.memory_space<vmem>>, vector<1x128xf32>
    %c8_i32_27 = arith.constant 8 : i32
    %74 = arith.addi %3, %c8_i32_27 : i32
    %c3_i32_28 = arith.constant 3 : i32
    %75 = arith.addi %74, %c3_i32_28 : i32
    %76 = arith.index_cast %75 : i32 to index
    %77 = memref.load %arg1[%76] : memref<16xi32, #tpu.memory_space<smem>>
    %78 = arith.index_cast %77 : i32 to index
    %c0_29 = arith.constant 0 : index
    %79 = vector.load %arg4[%78, %c0_29] : memref<64x128xf32, #tpu.memory_space<vmem>>, vector<1x128xf32>
    %c8_i32_30 = arith.constant 8 : i32
    %80 = arith.addi %3, %c8_i32_30 : i32
    %c4_i32_31 = arith.constant 4 : i32
    %81 = arith.addi %80, %c4_i32_31 : i32
    %82 = arith.index_cast %81 : i32 to index
    %83 = memref.load %arg1[%82] : memref<16xi32, #tpu.memory_space<smem>>
    %84 = arith.index_cast %83 : i32 to index
    %c0_32 = arith.constant 0 : index
    %85 = vector.load %arg4[%84, %c0_32] : memref<64x128xf32, #tpu.memory_space<vmem>>, vector<1x128xf32>
    %c8_i32_33 = arith.constant 8 : i32
    %86 = arith.addi %3, %c8_i32_33 : i32
    %c5_i32_34 = arith.constant 5 : i32
    %87 = arith.addi %86, %c5_i32_34 : i32
    %88 = arith.index_cast %87 : i32 to index
    %89 = memref.load %arg1[%88] : memref<16xi32, #tpu.memory_space<smem>>
    %90 = arith.index_cast %89 : i32 to index
    %c0_35 = arith.constant 0 : index
    %91 = vector.load %arg4[%90, %c0_35] : memref<64x128xf32, #tpu.memory_space<vmem>>, vector<1x128xf32>
    %c8_i32_36 = arith.constant 8 : i32
    %92 = arith.addi %3, %c8_i32_36 : i32
    %c6_i32_37 = arith.constant 6 : i32
    %93 = arith.addi %92, %c6_i32_37 : i32
    %94 = arith.index_cast %93 : i32 to index
    %95 = memref.load %arg1[%94] : memref<16xi32, #tpu.memory_space<smem>>
    %96 = arith.index_cast %95 : i32 to index
    %c0_38 = arith.constant 0 : index
    %97 = vector.load %arg4[%96, %c0_38] : memref<64x128xf32, #tpu.memory_space<vmem>>, vector<1x128xf32>
    %c8_i32_39 = arith.constant 8 : i32
    %98 = arith.addi %3, %c8_i32_39 : i32
    %c7_i32_40 = arith.constant 7 : i32
    %99 = arith.addi %98, %c7_i32_40 : i32
    %100 = arith.index_cast %99 : i32 to index
    %101 = memref.load %arg1[%100] : memref<16xi32, #tpu.memory_space<smem>>
    %102 = arith.index_cast %101 : i32 to index
    %c0_41 = arith.constant 0 : index
    %103 = vector.load %arg4[%102, %c0_41] : memref<64x128xf32, #tpu.memory_space<vmem>>, vector<1x128xf32>
    %104 = tpu.concatenate %61, %67, %73, %79, %85, %91, %97, %103 in 0 : vector<1x128xf32>, vector<1x128xf32>, vector<1x128xf32>, vector<1x128xf32>, vector<1x128xf32>, vector<1x128xf32>, vector<1x128xf32>, vector<1x128xf32> -> vector<8x128xf32>
    %cst_42 = arith.constant 5.65685415 : f32
    %105 = vector.broadcast %cst_42 : f32 to vector<8x128xf32>
    %106 = arith.mulf %104, %105 : vector<8x128xf32>
    %c8 = arith.constant 8 : index
    %c0_43 = arith.constant 0 : index
    %107 = vector.load %arg3[%c8, %c0_43] : memref<16x128xf32, #tpu.memory_space<vmem>>, vector<8x128xf32>
    tpu.vector_store %arg3[%c8, %c0_43], %106 {strides = array<i32>} : memref<16x128xf32, #tpu.memory_space<vmem>>, vector<8x128xf32>,
    return
  }
  func.func @transform_1(%arg0: i32, %arg1: memref<16xi32, #tpu.memory_space<smem>>) -> (i32, i32) {
    %c0_i32 = arith.constant 0 : i32
    %c0_i32_0 = arith.constant 0 : i32
    return %arg0, %c0_i32 : i32, i32
  }
}

</mosaic_0001>

<bundles_post_ra>
// kernel: tpu_custom_call.1
= control target key start
LH: loop header
LB: loop body
LE: loop exit
PB: predicated region body
PF: predicated region fallthrough
CT: control target
= control target key end

     0   :  { %s355_s0 = inlined_call_operand.hbm [shape: s32[16], index: 0, kind: input, shape index: {}]   ;;  %s356_s1 = inlined_call_operand.hbm [shape: f32[64,128], index: 1, kind: input, shape index: {}]   ;;  %s357_s2 = inlined_call_operand.hbm [shape: f32[16,128], index: 2, kind: output, shape index: {}]  }
   0x1   :  { %s213_s11 = scalar_lea.hbm %s355_s0, 16 }
   0x2   :  { %p214_p0 = scmp.ne.s32.totalorder %s355_s0, %s213_s11  ;;  %p217_p1 = scmp.lt.u32.totalorder %s213_s11, %s355_s0 }
   0x4   :  { %p219_p2 = pnand %p217_p1, %p214_p0 }
   0x6   :  { %222 = shalt.err (!%p219_p2)  }
   0x7   :  { %s273_s16 = smov [#allocation4]  }
   0x8   :  { %8 = dma.hbm_to_smem %s355_s0, 16, %s273_s16, [#allocation3] }
   0x9   :  { %267 = dma.done.wait [#allocation3], 16 }
   0xa   :  { %268 = vsyncadd [#allocation3], 4294967280 }
   0xb   :  { %10 = sfence }
   0xc   :  { %11 = vsyncpa [#allocation6], 0 }
   0xd   :  { %s274_s19 = smov [#allocation2]   ;;  %s223_s23 = scalar_lea.hbm %s356_s1, 1024 }
   0xe   :  { %s23_s20 = sshll.u32 %s274_s19, 4  ;;  %p224_p3 = scmp.ne.s32.totalorder %s356_s1, %s223_s23  ;;  %s24_s20 = int_to_ptr.vmem [resolvable:$true] %s23_s20 }
   0xf   :  { %p227_p4 = scmp.lt.u32.totalorder %s223_s23, %s356_s1 }
  0x11   :  { %p229_p5 = pnand %p227_p4, %p224_p3 }
  0x13   :  { %232 = shalt.err (!%p229_p5)  }
  0x14   :  { %s233_s0 = scalar_lea.vmem %s24_s20, 1024  ;;  %p238_p7 = scmp.lt.s32.totalorder %s24_s20, %s24_s20 }
  0x15   :  { %p234_p6 = scmp.ne.s32.totalorder %s24_s20, %s233_s0  ;;  %p239_p8 = scmp.lt.s32.totalorder %s233_s0, %s233_s0 }
  0x17   :  { %p240_p9 = por %p239_p8, %p238_p7 }
  0x19   :  { %p241_p10 = pnand %p240_p9, %p234_p6 }
  0x1b   :  { %244 = shalt.err (!%p241_p10)  }
  0x1c   :  { %26 = dma.hbm_to_vmem [thread:$0]  %s356_s1, 1024, %s24_s20, [#allocation7] }
  0x1d   :  { %269 = dma.done.wait [#allocation7], 1024 }
  0x1e   :  { %270 = vsyncadd [#allocation7], 4294966272  ;;  %s31_s30 = sld [smem:[#allocation4]]  ;;  %s193_s3 = sld [smem:[#allocation4 + $0x1]]  ;;  %vm83_vm0 = vcmask 1040384   ;;  %vm85_vm1 = vcmask 1041408  }
  0x1f   :  { %s194_s4 = sld [smem:[#allocation4 + $0x2]]  ;;  %s195_s5 = sld [smem:[#allocation4 + $0x3]]  ;;  %vm87_vm2 = vcmask 1042432   ;;  %vm89_vm3 = vcmask 1043456   ;;  %vm91_vm4 = vcmask 1044480   ;;  %vm93_vm5 = vcmask 1045504  }
  0x20   :  { %s196_s6 = sld [smem:[#allocation4 + $0x4]]  ;;  %s197_s7 = sld [smem:[#allocation4 + $0x5]]  ;;  %vm95_vm6 = vcmask 1046528  }
  0x21   :  { %s198_s8 = sld [smem:[#allocation4 + $0x6]]  ;;  %s199_s9 = sld [smem:[#allocation4 + $0x7]] }
  0x22   :  { %s317_s10 = sld [smem:[#allocation4 + $0x8]]  ;;  %s319_s11 = sld [smem:[#allocation4 + $0x9]] }
  0x23   :  { %s321_s12 = sld [smem:[#allocation4 + $0xa]]  ;;  %s323_s13 = sld [smem:[#allocation4 + $0xb]] }
  0x24   :  { %s32_s1 = scalar_lea.vmem [#allocation2], %s31_s30  ;;  %s36_s14 = scalar_lea.vmem [#allocation2], %s193_s3 }
  0x25   :  { %v33_v0 = vld [vmem:[%s32_s1] sm:$0x1]  ;;  %s40_s15 = scalar_lea.vmem [#allocation2], %s194_s4  ;;  %s44_s16 = scalar_lea.vmem [#allocation2], %s195_s5 }
  0x26   :  { %v37_v1 = vld [vmem:[%s36_s14] sm:$0x1]  ;;  %s48_s17 = scalar_lea.vmem [#allocation2], %s196_s6  ;;  %s52_s18 = scalar_lea.vmem [#allocation2], %s197_s7 }
  0x27   :  { %v41_v2 = vld [vmem:[%s40_s15] sm:$0x1]  ;;  %s56_s19 = scalar_lea.vmem [#allocation2], %s198_s8  ;;  %s60_s20 = scalar_lea.vmem [#allocation2], %s199_s9  ;;  %v63_v8 = vrot.slane %v37_v1, 7 }
  0x28   :  { %v45_v3 = vld [vmem:[%s44_s16] sm:$0x1]  ;;  %v66_v9 = vrot.slane %v41_v2, 6  ;;  %s101_s21 = scalar_lea.vmem [#allocation2], %s317_s10  ;;  %s105_s22 = scalar_lea.vmem [#allocation2], %s319_s11 }
  0x29   :  { %v49_v4 = vld [vmem:[%s48_s17] sm:$0x1]  ;;  %v69_v10 = vrot.slane %v45_v3, 5  ;;  %v84_v15 = vsel %vm83_vm0, %v33_v0, %v63_v8  ;;  %s109_s23 = scalar_lea.vmem [#allocation2], %s321_s12  ;;  %s204_s24 = sld [smem:[#allocation4 + $0xc]] }
  0x2a   :  { %v53_v5 = vld [vmem:[%s52_s18] sm:$0x1]  ;;  %v72_v11 = vrot.slane %v49_v4, 4  ;;  %v86_v18 = vsel %vm85_vm1, %v84_v15, %v66_v9  ;;  %s113_s25 = scalar_lea.vmem [#allocation2], %s323_s13  ;;  %s205_s26 = sld [smem:[#allocation4 + $0xd]] }
  0x2b   :  { %v57_v6 = vld [vmem:[%s56_s19] sm:$0x1]  ;;  %v75_v12 = vrot.slane %v53_v5, 3  ;;  %v88_v21 = vsel %vm87_vm2, %v86_v18, %v69_v10  ;;  %s206_s27 = sld [smem:[#allocation4 + $0xe]]  ;;  %s207_s0 = sld [smem:[#allocation4 + $0xf]] }
  0x2c   :  { %v61_v7 = vld [vmem:[%s60_s20] sm:$0x1]  ;;  %v78_v13 = vrot.slane %v57_v6, 2  ;;  %v90_v23 = vsel %vm89_vm3, %v88_v21, %v72_v11  ;;  %s275_s4 = smov [#allocation5]  }
  0x2d   :  { %v81_v14 = vrot.slane %v61_v7, 1  ;;  %v102_v16 = vld [vmem:[%s101_s21] sm:$0x1]  ;;  %v92_v26 = vsel %vm91_vm4, %v90_v23, %v75_v12  ;;  %s166_s5 = sshll.u32 %s275_s4, 4  ;;  %s167_s5 = int_to_ptr.vmem [resolvable:$true] %s166_s5 }
  0x2e   :  { %v106_v17 = vld [vmem:[%s105_s22] sm:$0x1]  ;;  %v94_v28 = vsel %vm93_vm5, %v92_v26, %v78_v13  ;;  %s245_s6 = scalar_lea.vmem %s167_s5, 256  ;;  %p250_p12 = scmp.lt.s32.totalorder %s167_s5, %s167_s5 }
  0x2f   :  { %v110_v19 = vld [vmem:[%s109_s23] sm:$0x1]  ;;  %v132_v20 = vrot.slane %v106_v17, 7  ;;  %v96_v30 = vsel %vm95_vm6, %v94_v28, %v81_v14  ;;  %s117_s28 = scalar_lea.vmem [#allocation2], %s204_s24  ;;  %p246_p11 = scmp.ne.s32.totalorder %s167_s5, %s245_s6 }
  0x30   :  { %v114_v22 = vld [vmem:[%s113_s25] sm:$0x1]  ;;  %v135_v24 = vrot.slane %v110_v19, 6  ;;  %v97_v31 = vmul.f32 5.656854, %v96_v30  ;;  %s121_s29 = scalar_lea.vmem [#allocation2], %s205_s26  ;;  %p251_p13 = scmp.lt.s32.totalorder %s245_s6, %s245_s6 }
  0x31   :  { %v152_v25 = vsel %vm83_vm0, %v102_v16, %v132_v20  ;;  %v138_v27 = vrot.slane %v114_v22, 5  ;;  %v118_v32 = vld [vmem:[%s117_s28] sm:$0x1]  ;;  %s125_s30 = scalar_lea.vmem [#allocation2], %s206_s27  ;;  %s129_s3 = scalar_lea.vmem [#allocation2], %s207_s0 }
  0x32   :  { %v153_v29 = vsel %vm85_vm1, %v152_v25, %v135_v24  ;;  %98 = vst [vmem:[#allocation5] sm:$0xff] %v97_v31  ;;  %v122_v34 = vld [vmem:[%s121_s29] sm:$0x1]  ;;  %v141_v36 = vrot.slane %v118_v32, 4  ;;  %p252_p0 = por %p251_p13, %p250_p12 }
  0x33   :  { %v154_v33 = vsel %vm87_vm2, %v153_v29, %v138_v27  ;;  %v126_v35 = vld [vmem:[%s125_s30] sm:$0x1]  ;;  %v144_v38 = vrot.slane %v122_v34, 3 }
  0x34   :  { %v130_v37 = vld [vmem:[%s129_s3] sm:$0x1]  ;;  %v147_v39 = vrot.slane %v126_v35, 2  ;;  %v155_v41 = vsel %vm89_vm3, %v154_v33, %v141_v36  ;;  %p253_p1 = pnand %p252_p0, %p246_p11 }
  0x35   :  { %v150_v40 = vrot.slane %v130_v37, 1  ;;  %v156_v42 = vsel %vm91_vm4, %v155_v41, %v144_v38 }
  0x36   :  { %v157_v43 = vsel %vm93_vm5, %v156_v42, %v147_v39 }
  0x37   :  { %v158_v44 = vsel %vm95_vm6, %v157_v43, %v150_v40 }
  0x38   :  { %v159_v45 = vmul.f32 5.656854, %v158_v44 }
  0x3a   :  { %160 = vst [vmem:[#allocation5 + $0x8] sm:$0xff] %v159_v45 }
  0x3b   :  { %256 = shalt.err (!%p253_p1)
}
  0x3c   :  { %s257_s9 = scalar_lea.hbm %s357_s2, 256 }
  0x3d   :  { %p258_p2 = scmp.ne.s32.totalorder %s357_s2, %s257_s9  ;;  %p261_p3 = scmp.lt.u32.totalorder %s257_s9, %s357_s2 }
  0x3f   :  { %p263_p4 = pnand %p261_p3, %p258_p2 }
  0x41   :  { %266 = shalt.err (!%p263_p4)
}
  0x42   :  { %s276_s1 = smov 128   ;;  %s277_s14 = smov 8  }
  0x43   :  { %172 = dma.vmem_to_hbm [thread:$0]  %s167_s5, 256, %s357_s2, [#allocation6], %s276_s1, %s276_s1, %s277_s14  }
  0x44   :  { %271 = dma.done.wait [#allocation6], 256  }
  0x45   :  { %272 = vsyncadd [#allocation6], 4294967040 }
  0x46   :  { %176 = vsyncpa [#allocation6], 1 }

</bundles_post_ra>
